<compile_context>
chip_gen: v7x
topology: tpu7x:2x2x1
jax: 0.10.0
libtpu: 0.0.40
codegen_flags: <defaults>
</compile_context>

<pallas_src>
import numpy as np
import jax
import jax.numpy as jnp
from jax import lax
from jax.experimental import pallas as pl
from jax.experimental.pallas import tpu as pltpu

NEG_SLOPE = 0.2
COMPUTE_DTYPE = jnp.bfloat16
LANE = 128            # lane width; tile_l is always a multiple of this
HALO = 128            # halo width (covers max (K-1)//S of all layers)

# Per-generation tiling knobs (v7x-safe defaults, bigger tiles on 128 MiB parts)
try:
    _VMEM_CAP = int(pltpu.get_tpu_info().vmem_capacity_bytes)
except Exception:  # noqa: BLE001 - fall back to the conservative (v7x) budget
    _VMEM_CAP = 64 << 20
if _VMEM_CAP >= (100 << 20):          # v5e / v6e class (128 MiB VMEM)
    MAX_TILE_L = 2048
    VMEM_BUDGET = 72 << 20
    VMEM_LIMIT_CAP = 100 << 20
else:                                  # v7x class (64 MiB VMEM) or unknown
    MAX_TILE_L = 1024
    VMEM_BUDGET = 38 << 20
    VMEM_LIMIT_CAP = 48 << 20


# ----------------------------------------------------------------------------
# Helpers
# ----------------------------------------------------------------------------
def get_padding(kernel_size, stride=1, dilation=1):
    p = dilation * (kernel_size - 1) + 1 - stride
    p = max(p, 0)
    return (p // 2, p - p // 2)


def _round_up(v, m):
    return ((v + m - 1) // m) * m


def _layer_footprint(tile_l, *, G, SC, Cout_g, n_q, halo, fused_head, C_out):
    """Rough per-core VMEM footprint (bytes) for one grid step."""
    bf = 2
    f = 2 * G * SC * tile_l * bf                        # main input block (x2 pipeline)
    f += (2 * G * SC * halo * bf) if halo else 0        # halo view (x2)
    f += 2 * (G * Cout_g * n_q * SC * bf)               # packed weights
    f += 2 * G * Cout_g * 4                             # bias
    f += 2 * G * Cout_g * tile_l * bf                   # output block (x2)
    f += G * SC * (tile_l + halo) * bf                  # xs staging scratch
    f += G * n_q * SC * tile_l * bf                     # gathered-tap scratch
    f += Cout_g * tile_l * 4 * 2                        # f32 dot result temporaries
    if fused_head:
        f += 2 * (C_out * bf + 4) + 2 * tile_l * bf
        f += C_out * tile_l * bf + tile_l * 4           # leaky(y) operand + head result
    return f


def _choose_tile(l_out_ceil, footprint_fn):
    tile = min(MAX_TILE_L, l_out_ceil)
    while tile > LANE and footprint_fn(tile) > VMEM_BUDGET:
        tile -= LANE
    while l_out_ceil % tile:            # avoid a ragged last tile
        tile -= LANE
    return tile


# ----------------------------------------------------------------------------
# Generic grouped / strided conv kernel (length-minor, tap-folded)
# ----------------------------------------------------------------------------
def make_conv_kernel(*, G, SC, n_q, tile_l, halo, leaky, fused_head):
    def _act(v):
        if not leaky:
            return v
        v32 = v.astype(jnp.float32)                         # activation math in f32
        return jnp.where(v32 >= 0, v32, NEG_SLOPE * v32).astype(COMPUTE_DTYPE)

    def _compute(xa_ref, xb_ref, w_ref, b_ref, wh_ref, bh_ref,
                 o_ref, oh_ref, xs_ref, xg_ref):
        # xa_ref : (1, G, SC, tile_l)        current length tile (bf16, polyphase)
        # xb_ref : (1, G, SC, HALO)          halo rows (next tile_l..tile_l+HALO)
        # w_ref  : (G, Cout_g, n_q*SC)       tap-folded weights (bf16, zero-padded)
        # b_ref  : (G, Cout_g, 1)            bias (f32)
        # wh_ref : (1, C_out) / bh_ref (1,1) fused 1x1 head (only on the k=5 layer)
        # o_ref  : (1, G, Cout_g, tile_l)    output tile (bf16, lane-dense stores)
        # oh_ref : (1, 1, tile_l)            fused head output tile
        # xs_ref : (G, SC, tile_l + halo)    staged input (LeakyReLU applied once)
        # xg_ref : (G, n_q*SC, tile_l)       gathered taps (contraction operand)
        xs_ref[:, :, :tile_l] = _act(xa_ref[0])
        if halo:
            xs_ref[:, :, tile_l:] = _act(xb_ref[0])

        # Gather taps: n_q aligned slab copies (lane-dense, sublane-aligned for SC>=8).
        for q in range(n_q):
            xg_ref[:, q * SC:(q + 1) * SC, :] = xs_ref[:, :, q:q + tile_l]

        if G == 1:
            acc = lax.dot_general(
                w_ref[0], xg_ref[0],
                dimension_numbers=(((1,), (0,)), ((), ())),
                preferred_element_type=jnp.float32)          # (Cout_g, tile_l)
            y = acc + b_ref[0]
            o_ref[0, 0] = y.astype(o_ref.dtype)
            if fused_head:
                # Final 1x1 conv on leaky(y) - fused, no HBM re-read of y.
                y32 = y.astype(COMPUTE_DTYPE).astype(jnp.float32)
                a = jnp.where(y32 >= 0, y32, NEG_SLOPE * y32).astype(COMPUTE_DTYPE)
                h = lax.dot_general(
                    wh_ref[...], a,
                    dimension_numbers=(((1,), (0,)), ((), ())),
                    preferred_element_type=jnp.float32)      # (1, tile_l)
                oh_ref[0] = (h + bh_ref[...]).astype(oh_ref.dtype)
        else:
            def body(g, carry):
                acc = lax.dot_general(
                    w_ref[g], xg_ref[g],
                    dimension_numbers=(((1,), (0,)), ((), ())),
                    preferred_element_type=jnp.float32)      # (Cout_g, tile_l) in vregs
                o_ref[0, g] = (acc + b_ref[g]).astype(o_ref.dtype)
                return carry
            lax.fori_loop(0, G, body, 0, unroll=(G <= 8))

    has_halo = halo > 0
    if has_halo and fused_head:
        def kernel(xa, xb, w, b, wh, bh, o, oh, xs, xg):
            _compute(xa, xb, w, b, wh, bh, o, oh, xs, xg)
    elif has_halo:
        def kernel(xa, xb, w, b, o, xs, xg):
            _compute(xa, xb, w, b, None, None, o, None, xs, xg)
    elif fused_head:
        def kernel(xa, w, b, wh, bh, o, oh, xs, xg):
            _compute(xa, None, w, b, wh, bh, o, oh, xs, xg)
    else:
        def kernel(xa, w, b, o, xs, xg):
            _compute(xa, None, w, b, None, None, o, None, xs, xg)
    return kernel


def conv1d_layer(x_ncl, layer):
    """One layer: (optional fused LeakyReLU) + grouped/strided Conv1d.

    x_ncl: (N, C_in, L) bf16 (NCL, length-minor).  Returns (N, C_out, L_out)
    bf16 NCL; if the layer carries a fused 1x1 head also returns (N, 1, L_out).
    """
    w, b = layer["w"], layer["b"]
    K, S, G = layer["k"], layer["stride"], layer["groups"]
    pad_l, pad_r = layer["padding"]
    leaky = layer["leaky"]
    fused_head = "wh" in layer

    N, C_in, L = x_ncl.shape
    Cin_g = C_in // G
    assert C_in == G * Cin_g
    SC = S * Cin_g
    n_q = -(-K // S)                        # ceil(K / S)
    G_w, Cout_g, KC = w.shape
    assert G_w == G and KC == n_q * SC, (w.shape, (G, n_q * SC))
    C_out = G * Cout_g

    L_out = (L + pad_l + pad_r - K) // S + 1
    assert L_out >= 1
    q_max = n_q - 1
    halo = HALO if q_max > 0 else 0
    assert q_max <= HALO

    L_out_ceil = _round_up(L_out, LANE)

    def footprint(t):
        return _layer_footprint(t, G=G, SC=SC, Cout_g=Cout_g, n_q=n_q,
                                halo=halo, fused_head=fused_head, C_out=C_out)

    tile_l = _choose_tile(L_out_ceil, footprint)
    assert tile_l % LANE == 0
    n_tiles = L_out_ceil // tile_l
    L_out_pad = L_out_ceil
    M_pad = L_out_pad + halo
    total = M_pad * S
    right = total - pad_l - L
    assert right >= 0, (right, total, pad_l, L)

    # Pad along length, then polyphase + group split:
    #   (N, C, M_pad*S) -> (N, G, S*Cin_g, M_pad); row index = r*Cin_g + ci.
    # For S == 1 this is a pure (free) reshape; for strided layers it is one
    # XLA transpose pass over the activation.
    x_p = jnp.pad(x_ncl, ((0, 0), (0, 0), (pad_l, right)))
    x_r = (x_p.reshape(N, G, Cin_g, M_pad, S)
              .transpose(0, 1, 4, 2, 3)
              .reshape(N, G, SC, M_pad))

    kernel = make_conv_kernel(G=G, SC=SC, n_q=n_q, tile_l=tile_l, halo=halo,
                              leaky=leaky, fused_head=fused_head)

    in_specs = [pl.BlockSpec((1, G, SC, tile_l), lambda n, l: (n, 0, 0, l))]
    operands = [x_r]
    if halo:
        step = tile_l // halo
        in_specs.append(pl.BlockSpec((1, G, SC, halo),
                                     lambda n, l: (n, 0, 0, (l + 1) * step)))
        operands.append(x_r)               # second view of the same array (halo rows)
    in_specs += [pl.BlockSpec((G, Cout_g, n_q * SC), lambda n, l: (0, 0, 0)),
                 pl.BlockSpec((G, Cout_g, 1), lambda n, l: (0, 0, 0))]
    operands += [w, b]
    out_shapes = [jax.ShapeDtypeStruct((N, G, Cout_g, L_out_pad), COMPUTE_DTYPE)]
    out_specs = [pl.BlockSpec((1, G, Cout_g, tile_l), lambda n, l: (n, 0, 0, l))]
    if fused_head:
        in_specs += [pl.BlockSpec((1, C_out), lambda n, l: (0, 0)),
                     pl.BlockSpec((1, 1), lambda n, l: (0, 0))]
        operands += [layer["wh"], layer["bh"]]
        out_shapes.append(jax.ShapeDtypeStruct((N, 1, L_out_pad), COMPUTE_DTYPE))
        out_specs.append(pl.BlockSpec((1, 1, tile_l), lambda n, l: (n, 0, l)))

    fp = footprint(tile_l)
    vmem_limit = int(min(VMEM_LIMIT_CAP, max(32 << 20, fp + (10 << 20))))

    outs = pl.pallas_call(
        kernel,
        out_shape=tuple(out_shapes),
        grid=(N, n_tiles),
        in_specs=in_specs,
        out_specs=tuple(out_specs),
        scratch_shapes=[pltpu.VMEM((G, SC, tile_l + halo), COMPUTE_DTYPE),
                        pltpu.VMEM((G, n_q * SC, tile_l), COMPUTE_DTYPE)],
        compiler_params=pltpu.CompilerParams(
            dimension_semantics=("parallel", "parallel"),
            vmem_limit_bytes=vmem_limit),
    )(*operands)

    y = outs[0]
    if L_out != L_out_pad:
        y = y[:, :, :, :L_out]
    y_ncl = y.reshape(N, C_out, L_out)     # group-major channels == PyTorch order
    if fused_head:
        h = outs[1]
        if L_out != L_out_pad:
            h = h[:, :, :L_out]
        return y_ncl, h
    return y_ncl


# ----------------------------------------------------------------------------
# Parameters (packed once into the kernel layout) and forward
# ----------------------------------------------------------------------------
def build_discriminator_params(in_size, capacity, multiplier, n_layers, rng):
    cfgs = []
    out_size = capacity
    cfgs.append(dict(in_c=in_size, out_c=out_size, k=15, stride=1, groups=1,
                     padding=get_padding(15, 1), leaky=False))
    for _ in range(n_layers):
        in_c = out_size
        out_size = min(1024, in_c * multiplier)
        cfgs.append(dict(in_c=in_c, out_c=out_size, k=41, stride=multiplier,
                         groups=out_size // capacity,
                         padding=get_padding(41, multiplier), leaky=True))
    cfgs.append(dict(in_c=out_size, out_c=out_size, k=5, stride=1, groups=1,
                     padding=get_padding(5, 1), leaky=True))
    cfgs.append(dict(in_c=out_size, out_c=1, k=1, stride=1, groups=1,
                     padding=get_padding(1, 1), leaky=True))

    raw, ref_layers = [], []
    for cfg in cfgs:
        G = cfg["groups"]
        cin_g = cfg["in_c"] // G
        fan_in = cin_g * cfg["k"]
        w = rng.standard_normal((cfg["out_c"], cin_g, cfg["k"])).astype(np.float32)
        w = w / np.sqrt(fan_in)
        b = 0.01 * rng.standard_normal((cfg["out_c"],)).astype(np.float32)
        raw.append((w, b))
        ref_layers.append(dict(w=jnp.asarray(w, COMPUTE_DTYPE),   # torch layout (O, I/G, K)
                               b=jnp.asarray(b, jnp.float32),
                               stride=cfg["stride"], padding=cfg["padding"],
                               groups=G, leaky=cfg["leaky"]))

    layers = []
    for idx, cfg in enumerate(cfgs[:-1]):          # last cfg (1x1 head) fused below
        w, b = raw[idx]
        G, K, S = cfg["groups"], cfg["k"], cfg["stride"]
        cin_g = cfg["in_c"] // G
        cout_g = cfg["out_c"] // G
        n_q = -(-K // S)
        SC = S * cin_g
        # Pack (C_out, Cin_g, K) -> (G, Cout_g, n_q*S*Cin_g); row = q*SC + r*Cin_g + ci,
        # zero-filled for q*S + r >= K (multiplies don't-care rows by exact zero).
        wp = np.zeros((G, cout_g, n_q, S, cin_g), np.float32)
        w_g = w.reshape(G, cout_g, cin_g, K)
        for t in range(K):
            q, r = divmod(t, S)
            wp[:, :, q, r, :] = w_g[:, :, :, t]
        wp = wp.reshape(G, cout_g, n_q * SC)
        layers.append(dict(k=K, stride=S, groups=G, padding=cfg["padding"],
                           leaky=cfg["leaky"],
                           w=jnp.asarray(wp, COMPUTE_DTYPE),
                           b=jnp.asarray(b.reshape(G, cout_g, 1), jnp.float32)))

    wf, bf_ = raw[-1]                               # fuse final 1x1 conv (C_out = 1)
    layers[-1]["wh"] = jnp.asarray(wf[:, :, 0], COMPUTE_DTYPE)     # (1, C_in)
    layers[-1]["bh"] = jnp.asarray(bf_.reshape(1, 1), jnp.float32)
    return layers, ref_layers


def discriminator_forward(x_ncl, layers):
    """Returns the list of feature maps (NCL, bf16) like the PyTorch module."""
    x = x_ncl.astype(COMPUTE_DTYPE)
    feats = []
    for layer in layers:
        out = conv1d_layer(x, layer)
        if "wh" in layer:                           # k=5 layer with fused 1x1 head
            x, head = out
            feats.append(x)
            feats.append(head)
        else:
            x = out
            feats.append(x)
    return feats


# ----------------------------------------------------------------------------
# Pure-JAX reference (mirrors the bf16 quantization of the kernel path)
# ----------------------------------------------------------------------------
def conv1d_ref(x_ncl, layer):
    xq = x_ncl.astype(jnp.bfloat16).astype(jnp.float32)
    if layer["leaky"]:
        xq = jnp.where(xq >= 0, xq, NEG_SLOPE * xq)
        xq = xq.astype(jnp.bfloat16).astype(jnp.float32)
    y = lax.conv_general_dilated(
        xq, layer["w"].astype(jnp.float32), window_strides=(layer["stride"],),
        padding=[layer["padding"]], dimension_numbers=("NCH", "OIH", "NCH"),
        feature_group_count=layer["groups"])
    return y + layer["b"][None, :, None]


if __name__ == "__main__":
    # Small config: Discriminator(in_size=1, capacity=16, multiplier=4, n_layers=2)
    N, C_IN, L = 2, 1, 64
    key = jax.random.PRNGKey(0)
    x = jax.random.normal(key, (N, C_IN, L), dtype=jnp.float32)

    layers, ref_layers = build_discriminator_params(
        in_size=C_IN, capacity=16, multiplier=4, n_layers=2,
        rng=np.random.default_rng(0))

    feats = discriminator_forward(x, layers)
    feats = jax.block_until_ready(feats)

    # Verify every feature map against the pure-JAX reference.
    xr = x
    for ref, f in zip(ref_layers, feats):
        xr = conv1d_ref(xr, ref)
        assert f.shape == xr.shape, (f.shape, xr.shape)
        np.testing.assert_allclose(np.asarray(f.astype(jnp.float32)),
                                   np.asarray(xr), rtol=4e-2, atol=4e-2)

    print("KERNEL_OK")
</pallas_src>

<mosaic_0001>
module attributes {stable_mosaic.version = 11 : i64} {
  func.func @kernel(%arg0: i32, %arg1: i32, %arg2: memref<1x1x1x128xbf16, #tpu.memory_space<vmem>>, %arg3: memref<1x1x1x128xbf16, #tpu.memory_space<vmem>>, %arg4: memref<1x16x15xbf16, #tpu.memory_space<vmem>>, %arg5: memref<1x16x1xf32, #tpu.memory_space<vmem>>, %arg6: memref<1x1x16x128xbf16, #tpu.memory_space<vmem>>, %arg7: memref<1x1x256xbf16, #tpu.memory_space<vmem>>, %arg8: memref<1x15x128xbf16, #tpu.memory_space<vmem>>) attributes {dimension_semantics = [#tpu.dimension_semantics<parallel>, #tpu.dimension_semantics<parallel>], iteration_bounds = array<i64: 2, 1>, scalar_prefetch = 0 : i64, scratch_operands = 2 : i64, tpu.core_type = #tpu.core_type<tc>, window_params = [{transform_indices = @transform_0, window_bounds = array<i64: 1, 1, 1, 128>}, {transform_indices = @transform_1, window_bounds = array<i64: 1, 1, 1, 128>}, {pipeline_mode = #tpu.pipeline_mode<synchronous>, transform_indices = @transform_2, window_bounds = array<i64: 1, 16, 15>}, {pipeline_mode = #tpu.pipeline_mode<synchronous>, transform_indices = @transform_3, window_bounds = array<i64: 1, 16, 1>}, {transform_indices = @transform_4, window_bounds = array<i64: 1, 1, 16, 128>}]} {
    %c0 = arith.constant 0 : index
    %c0_0 = arith.constant 0 : index
    %c0_1 = arith.constant 0 : index
    %c0_2 = arith.constant 0 : index
    %0 = vector.load %arg2[%c0, %c0_0, %c0_1, %c0_2] : memref<1x1x1x128xbf16, #tpu.memory_space<vmem>>, vector<1x1x1x128xbf16>
    %1 = vector.shape_cast %0 : vector<1x1x1x128xbf16> to vector<1x1x128xbf16>
    %c0_3 = arith.constant 0 : index
    %c0_4 = arith.constant 0 : index
    %c0_5 = arith.constant 0 : index
    %2 = vector.load %arg7[%c0_3, %c0_4, %c0_5] : memref<1x1x256xbf16, #tpu.memory_space<vmem>>, vector<1x1x128xbf16>
    tpu.vector_store %arg7[%c0_3, %c0_4, %c0_5], %1 {strides = array<i32>} : memref<1x1x256xbf16, #tpu.memory_space<vmem>>, vector<1x1x128xbf16>,
    %c0_6 = arith.constant 0 : index
    %c0_7 = arith.constant 0 : index
    %c0_8 = arith.constant 0 : index
    %c0_9 = arith.constant 0 : index
    %3 = vector.load %arg3[%c0_6, %c0_7, %c0_8, %c0_9] : memref<1x1x1x128xbf16, #tpu.memory_space<vmem>>, vector<1x1x1x128xbf16>
    %4 = vector.shape_cast %3 : vector<1x1x1x128xbf16> to vector<1x1x128xbf16>
    %c0_10 = arith.constant 0 : index
    %c0_11 = arith.constant 0 : index
    %c128 = arith.constant 128 : index
    %5 = vector.load %arg7[%c0_10, %c0_11, %c128] : memref<1x1x256xbf16, #tpu.memory_space<vmem>>, vector<1x1x128xbf16>
    tpu.vector_store %arg7[%c0_10, %c0_11, %c128], %4 {strides = array<i32>} : memref<1x1x256xbf16, #tpu.memory_space<vmem>>, vector<1x1x128xbf16>,
    %c0_12 = arith.constant 0 : index
    %c0_13 = arith.constant 0 : index
    %c0_14 = arith.constant 0 : index
    %6 = vector.load %arg7[%c0_12, %c0_13, %c0_14] : memref<1x1x256xbf16, #tpu.memory_space<vmem>>, vector<1x1x128xbf16>
    %c0_15 = arith.constant 0 : index
    %c0_16 = arith.constant 0 : index
    %c0_17 = arith.constant 0 : index
    %7 = vector.load %arg8[%c0_15, %c0_16, %c0_17] : memref<1x15x128xbf16, #tpu.memory_space<vmem>>, vector<1x1x128xbf16>
    tpu.vector_store %arg8[%c0_15, %c0_16, %c0_17], %6 {strides = array<i32>} : memref<1x15x128xbf16, #tpu.memory_space<vmem>>, vector<1x1x128xbf16>,
    %c0_18 = arith.constant 0 : index
    %c0_19 = arith.constant 0 : index
    %c1 = arith.constant 1 : index
    %8 = vector.load %arg7[%c0_18, %c0_19, %c1] : memref<1x1x256xbf16, #tpu.memory_space<vmem>>, vector<1x1x128xbf16>
    %c0_20 = arith.constant 0 : index
    %c1_21 = arith.constant 1 : index
    %c0_22 = arith.constant 0 : index
    %9 = vector.load %arg8[%c0_20, %c1_21, %c0_22] : memref<1x15x128xbf16, #tpu.memory_space<vmem>>, vector<1x1x128xbf16>
    tpu.vector_store %arg8[%c0_20, %c1_21, %c0_22], %8 {strides = array<i32>} : memref<1x15x128xbf16, #tpu.memory_space<vmem>>, vector<1x1x128xbf16>,
    %c0_23 = arith.constant 0 : index
    %c0_24 = arith.constant 0 : index
    %c2 = arith.constant 2 : index
    %10 = vector.load %arg7[%c0_23, %c0_24, %c2] : memref<1x1x256xbf16, #tpu.memory_space<vmem>>, vector<1x1x128xbf16>
    %c0_25 = arith.constant 0 : index
    %c2_26 = arith.constant 2 : index
    %c0_27 = arith.constant 0 : index
    %11 = vector.load %arg8[%c0_25, %c2_26, %c0_27] : memref<1x15x128xbf16, #tpu.memory_space<vmem>>, vector<1x1x128xbf16>
    tpu.vector_store %arg8[%c0_25, %c2_26, %c0_27], %10 {strides = array<i32>} : memref<1x15x128xbf16, #tpu.memory_space<vmem>>, vector<1x1x128xbf16>,
    %c0_28 = arith.constant 0 : index
    %c0_29 = arith.constant 0 : index
    %c3 = arith.constant 3 : index
    %12 = vector.load %arg7[%c0_28, %c0_29, %c3] : memref<1x1x256xbf16, #tpu.memory_space<vmem>>, vector<1x1x128xbf16>
    %c0_30 = arith.constant 0 : index
    %c3_31 = arith.constant 3 : index
    %c0_32 = arith.constant 0 : index
    %13 = vector.load %arg8[%c0_30, %c3_31, %c0_32] : memref<1x15x128xbf16, #tpu.memory_space<vmem>>, vector<1x1x128xbf16>
    tpu.vector_store %arg8[%c0_30, %c3_31, %c0_32], %12 {strides = array<i32>} : memref<1x15x128xbf16, #tpu.memory_space<vmem>>, vector<1x1x128xbf16>,
    %c0_33 = arith.constant 0 : index
    %c0_34 = arith.constant 0 : index
    %c4 = arith.constant 4 : index
    %14 = vector.load %arg7[%c0_33, %c0_34, %c4] : memref<1x1x256xbf16, #tpu.memory_space<vmem>>, vector<1x1x128xbf16>
    %c0_35 = arith.constant 0 : index
    %c4_36 = arith.constant 4 : index
    %c0_37 = arith.constant 0 : index
    %15 = vector.load %arg8[%c0_35, %c4_36, %c0_37] : memref<1x15x128xbf16, #tpu.memory_space<vmem>>, vector<1x1x128xbf16>
    tpu.vector_store %arg8[%c0_35, %c4_36, %c0_37], %14 {strides = array<i32>} : memref<1x15x128xbf16, #tpu.memory_space<vmem>>, vector<1x1x128xbf16>,
    %c0_38 = arith.constant 0 : index
    %c0_39 = arith.constant 0 : index
    %c5 = arith.constant 5 : index
    %16 = vector.load %arg7[%c0_38, %c0_39, %c5] : memref<1x1x256xbf16, #tpu.memory_space<vmem>>, vector<1x1x128xbf16>
    %c0_40 = arith.constant 0 : index
    %c5_41 = arith.constant 5 : index
    %c0_42 = arith.constant 0 : index
    %17 = vector.load %arg8[%c0_40, %c5_41, %c0_42] : memref<1x15x128xbf16, #tpu.memory_space<vmem>>, vector<1x1x128xbf16>
    tpu.vector_store %arg8[%c0_40, %c5_41, %c0_42], %16 {strides = array<i32>} : memref<1x15x128xbf16, #tpu.memory_space<vmem>>, vector<1x1x128xbf16>,
    %c0_43 = arith.constant 0 : index
    %c0_44 = arith.constant 0 : index
    %c6 = arith.constant 6 : index
    %18 = vector.load %arg7[%c0_43, %c0_44, %c6] : memref<1x1x256xbf16, #tpu.memory_space<vmem>>, vector<1x1x128xbf16>
    %c0_45 = arith.constant 0 : index
    %c6_46 = arith.constant 6 : index
    %c0_47 = arith.constant 0 : index
    %19 = vector.load %arg8[%c0_45, %c6_46, %c0_47] : memref<1x15x128xbf16, #tpu.memory_space<vmem>>, vector<1x1x128xbf16>
    tpu.vector_store %arg8[%c0_45, %c6_46, %c0_47], %18 {strides = array<i32>} : memref<1x15x128xbf16, #tpu.memory_space<vmem>>, vector<1x1x128xbf16>,
    %c0_48 = arith.constant 0 : index
    %c0_49 = arith.constant 0 : index
    %c7 = arith.constant 7 : index
    %20 = vector.load %arg7[%c0_48, %c0_49, %c7] : memref<1x1x256xbf16, #tpu.memory_space<vmem>>, vector<1x1x128xbf16>
    %c0_50 = arith.constant 0 : index
    %c7_51 = arith.constant 7 : index
    %c0_52 = arith.constant 0 : index
    %21 = vector.load %arg8[%c0_50, %c7_51, %c0_52] : memref<1x15x128xbf16, #tpu.memory_space<vmem>>, vector<1x1x128xbf16>
    tpu.vector_store %arg8[%c0_50, %c7_51, %c0_52], %20 {strides = array<i32>} : memref<1x15x128xbf16, #tpu.memory_space<vmem>>, vector<1x1x128xbf16>,
    %c0_53 = arith.constant 0 : index
    %c0_54 = arith.constant 0 : index
    %c8 = arith.constant 8 : index
    %22 = vector.load %arg7[%c0_53, %c0_54, %c8] : memref<1x1x256xbf16, #tpu.memory_space<vmem>>, vector<1x1x128xbf16>
    %c0_55 = arith.constant 0 : index
    %c8_56 = arith.constant 8 : index
    %c0_57 = arith.constant 0 : index
    %23 = vector.load %arg8[%c0_55, %c8_56, %c0_57] : memref<1x15x128xbf16, #tpu.memory_space<vmem>>, vector<1x1x128xbf16>
    tpu.vector_store %arg8[%c0_55, %c8_56, %c0_57], %22 {strides = array<i32>} : memref<1x15x128xbf16, #tpu.memory_space<vmem>>, vector<1x1x128xbf16>,
    %c0_58 = arith.constant 0 : index
    %c0_59 = arith.constant 0 : index
    %c9 = arith.constant 9 : index
    %24 = vector.load %arg7[%c0_58, %c0_59, %c9] : memref<1x1x256xbf16, #tpu.memory_space<vmem>>, vector<1x1x128xbf16>
    %c0_60 = arith.constant 0 : index
    %c9_61 = arith.constant 9 : index
    %c0_62 = arith.constant 0 : index
    %25 = vector.load %arg8[%c0_60, %c9_61, %c0_62] : memref<1x15x128xbf16, #tpu.memory_space<vmem>>, vector<1x1x128xbf16>
    tpu.vector_store %arg8[%c0_60, %c9_61, %c0_62], %24 {strides = array<i32>} : memref<1x15x128xbf16, #tpu.memory_space<vmem>>, vector<1x1x128xbf16>,
    %c0_63 = arith.constant 0 : index
    %c0_64 = arith.constant 0 : index
    %c10 = arith.constant 10 : index
    %26 = vector.load %arg7[%c0_63, %c0_64, %c10] : memref<1x1x256xbf16, #tpu.memory_space<vmem>>, vector<1x1x128xbf16>
    %c0_65 = arith.constant 0 : index
    %c10_66 = arith.constant 10 : index
    %c0_67 = arith.constant 0 : index
    %27 = vector.load %arg8[%c0_65, %c10_66, %c0_67] : memref<1x15x128xbf16, #tpu.memory_space<vmem>>, vector<1x1x128xbf16>
    tpu.vector_store %arg8[%c0_65, %c10_66, %c0_67], %26 {strides = array<i32>} : memref<1x15x128xbf16, #tpu.memory_space<vmem>>, vector<1x1x128xbf16>,
    %c0_68 = arith.constant 0 : index
    %c0_69 = arith.constant 0 : index
    %c11 = arith.constant 11 : index
    %28 = vector.load %arg7[%c0_68, %c0_69, %c11] : memref<1x1x256xbf16, #tpu.memory_space<vmem>>, vector<1x1x128xbf16>
    %c0_70 = arith.constant 0 : index
    %c11_71 = arith.constant 11 : index
    %c0_72 = arith.constant 0 : index
    %29 = vector.load %arg8[%c0_70, %c11_71, %c0_72] : memref<1x15x128xbf16, #tpu.memory_space<vmem>>, vector<1x1x128xbf16>
    tpu.vector_store %arg8[%c0_70, %c11_71, %c0_72], %28 {strides = array<i32>} : memref<1x15x128xbf16, #tpu.memory_space<vmem>>, vector<1x1x128xbf16>,
    %c0_73 = arith.constant 0 : index
    %c0_74 = arith.constant 0 : index
    %c12 = arith.constant 12 : index
    %30 = vector.load %arg7[%c0_73, %c0_74, %c12] : memref<1x1x256xbf16, #tpu.memory_space<vmem>>, vector<1x1x128xbf16>
    %c0_75 = arith.constant 0 : index
    %c12_76 = arith.constant 12 : index
    %c0_77 = arith.constant 0 : index
    %31 = vector.load %arg8[%c0_75, %c12_76, %c0_77] : memref<1x15x128xbf16, #tpu.memory_space<vmem>>, vector<1x1x128xbf16>
    tpu.vector_store %arg8[%c0_75, %c12_76, %c0_77], %30 {strides = array<i32>} : memref<1x15x128xbf16, #tpu.memory_space<vmem>>, vector<1x1x128xbf16>,
    %c0_78 = arith.constant 0 : index
    %c0_79 = arith.constant 0 : index
    %c13 = arith.constant 13 : index
    %32 = vector.load %arg7[%c0_78, %c0_79, %c13] : memref<1x1x256xbf16, #tpu.memory_space<vmem>>, vector<1x1x128xbf16>
    %c0_80 = arith.constant 0 : index
    %c13_81 = arith.constant 13 : index
    %c0_82 = arith.constant 0 : index
    %33 = vector.load %arg8[%c0_80, %c13_81, %c0_82] : memref<1x15x128xbf16, #tpu.memory_space<vmem>>, vector<1x1x128xbf16>
    tpu.vector_store %arg8[%c0_80, %c13_81, %c0_82], %32 {strides = array<i32>} : memref<1x15x128xbf16, #tpu.memory_space<vmem>>, vector<1x1x128xbf16>,
    %c0_83 = arith.constant 0 : index
    %c0_84 = arith.constant 0 : index
    %c14 = arith.constant 14 : index
    %34 = vector.load %arg7[%c0_83, %c0_84, %c14] : memref<1x1x256xbf16, #tpu.memory_space<vmem>>, vector<1x1x128xbf16>
    %c0_85 = arith.constant 0 : index
    %c14_86 = arith.constant 14 : index
    %c0_87 = arith.constant 0 : index
    %35 = vector.load %arg8[%c0_85, %c14_86, %c0_87] : memref<1x15x128xbf16, #tpu.memory_space<vmem>>, vector<1x1x128xbf16>
    tpu.vector_store %arg8[%c0_85, %c14_86, %c0_87], %34 {strides = array<i32>} : memref<1x15x128xbf16, #tpu.memory_space<vmem>>, vector<1x1x128xbf16>,
    %c0_88 = arith.constant 0 : index
    %c0_89 = arith.constant 0 : index
    %c0_90 = arith.constant 0 : index
    %36 = vector.load %arg4[%c0_88, %c0_89, %c0_90] : memref<1x16x15xbf16, #tpu.memory_space<vmem>>, vector<1x16x15xbf16>
    %37 = vector.shape_cast %36 : vector<1x16x15xbf16> to vector<16x15xbf16>
    %c0_91 = arith.constant 0 : index
    %c0_92 = arith.constant 0 : index
    %c0_93 = arith.constant 0 : index
    %38 = vector.load %arg8[%c0_91, %c0_92, %c0_93] : memref<1x15x128xbf16, #tpu.memory_space<vmem>>, vector<1x15x128xbf16>
    %39 = vector.shape_cast %38 : vector<1x15x128xbf16> to vector<15x128xbf16>
    %cst = arith.constant dense<0.000000e+00> : vector<16x128xf32>
    %40 = tpu.matmul %37, %39, %cst {dimension_numbers = #tpu.dot_dimension_numbers<[1], [0], [0], [1], [0, 0, 1, 1], [], []>} : vector<16x15xbf16>, vector<15x128xbf16>, vector<16x128xf32> -> vector<16x128xf32>
    %c0_94 = arith.constant 0 : index
    %c0_95 = arith.constant 0 : index
    %c0_96 = arith.constant 0 : index
    %41 = vector.load %arg5[%c0_94, %c0_95, %c0_96] : memref<1x16x1xf32, #tpu.memory_space<vmem>>, vector<1x16x1xf32>
    %42 = vector.shape_cast %41 : vector<1x16x1xf32> to vector<16x1xf32>
    %43 = vector.broadcast %42 : vector<16x1xf32> to vector<16x128xf32>
    %44 = arith.addf %40, %43 : vector<16x128xf32>
    %45 = arith.truncf %44 : vector<16x128xf32> to vector<16x128xbf16>
    %c0_97 = arith.constant 0 : index
    %c0_98 = arith.constant 0 : index
    %c0_99 = arith.constant 0 : index
    %c0_100 = arith.constant 0 : index
    %46 = vector.load %arg6[%c0_97, %c0_98, %c0_99, %c0_100] : memref<1x1x16x128xbf16, #tpu.memory_space<vmem>>, vector<1x1x16x128xbf16>
    %47 = vector.shape_cast %46 : vector<1x1x16x128xbf16> to vector<16x128xbf16>
    %48 = vector.shape_cast %45 : vector<16x128xbf16> to vector<1x1x16x128xbf16>
    tpu.vector_store %arg6[%c0_97, %c0_98, %c0_99, %c0_100], %48 {strides = array<i32>} : memref<1x1x16x128xbf16, #tpu.memory_space<vmem>>, vector<1x1x16x128xbf16>,
    return
  }
  func.func @transform_0(%arg0: i32, %arg1: i32) -> (i32, i32, i32, i32) {
    %c0_i32 = arith.constant 0 : i32
    %c0_i32_0 = arith.constant 0 : i32
    %c0_i32_1 = arith.constant 0 : i32
    return %arg0, %c0_i32, %c0_i32_0, %arg1 : i32, i32, i32, i32
  }
  func.func @transform_1(%arg0: i32, %arg1: i32) -> (i32, i32, i32, i32) {
    %c1_i32 = arith.constant 1 : i32
    %0 = arith.addi %arg1, %c1_i32 : i32
    %c1_i32_0 = arith.constant 1 : i32
    %1 = arith.muli %0, %c1_i32_0 : i32
    %c0_i32 = arith.constant 0 : i32
    %c0_i32_1 = arith.constant 0 : i32
    %c0_i32_2 = arith.constant 0 : i32
    return %arg0, %c0_i32, %c0_i32_1, %1 : i32, i32, i32, i32
  }
  func.func @transform_2(%arg0: i32, %arg1: i32) -> (i32, i32, i32) {
    %c0_i32 = arith.constant 0 : i32
    %c0_i32_0 = arith.constant 0 : i32
    %c0_i32_1 = arith.constant 0 : i32
    %c0_i32_2 = arith.constant 0 : i32
    return %c0_i32, %c0_i32_0, %c0_i32_1 : i32, i32, i32
  }
  func.func @transform_3(%arg0: i32, %arg1: i32) -> (i32, i32, i32) {
    %c0_i32 = arith.constant 0 : i32
    %c0_i32_0 = arith.constant 0 : i32
    %c0_i32_1 = arith.constant 0 : i32
    %c0_i32_2 = arith.constant 0 : i32
    return %c0_i32, %c0_i32_0, %c0_i32_1 : i32, i32, i32
  }
  func.func @transform_4(%arg0: i32, %arg1: i32) -> (i32, i32, i32, i32) {
    %c0_i32 = arith.constant 0 : i32
    %c0_i32_0 = arith.constant 0 : i32
    %c0_i32_1 = arith.constant 0 : i32
    return %arg0, %c0_i32, %c0_i32_0, %arg1 : i32, i32, i32, i32
  }
}

</mosaic_0001>

<bundles_post_ra>
// kernel: tpu_custom_call.1
= control target key start
LH: loop header
LB: loop body
LE: loop exit
PB: predicated region body
PF: predicated region fallthrough
CT: control target
= control target key end

     0   :  { %9 = vsyncpa [#allocation5], 0  ;;  %s1321_s0 = inlined_call_operand.vmem [shape: bf16[2,1,1,256], index: 0, kind: input, shape index: {}]   ;;  %s1322_s1 = inlined_call_operand.vmem [shape: bf16[2,1,1,256], index: 1, kind: input, shape index: {}]   ;;  %s1323_s2 = inlined_call_operand.vmem [shape: bf16[1,16,15], index: 2, kind: input, shape index: {}]   ;;  %s1324_s3 = inlined_call_operand.vmem [shape: f32[1,16,1], index: 3, kind: input, shape index: {}]   ;;  %s1325_s4 = inlined_call_operand.hbm [shape: bf16[2,1,16,128], index: 4, kind: output, shape index: {}]  }
   0x1   :  { %11 = vsyncpa [#allocation5 + $0x1], 0  ;;  %s1118_s15 = smov 0   ;;  %s1120_s16 = smov 0  }
   0x2   :  { %s1122_s17 = smov 0   ;;  %s1124_s18 = smov 0  }
   0x3   :  { %s1126_s19 = smov 0   ;;  %s1128_s20 = smov 0  }
   0x4 LB: > { %s863_s21 = sadd.s32 4294967295, %s1069_s20   ;;  %s864_s22 = sadd.s32 4294967294, %s1069_s20   ;;  %s1069_s20 = sphi %s1128_s20, %s17_s20   ;;  %s1065_s19 = sphi %s1126_s19, %s1348_s19   ;;  %s1061_s18 = sphi %s1124_s18, %s1347_s18   ;;  %s1057_s17 = sphi %s1122_s17, %s1346_s17   ;;  %s1053_s16 = sphi %s1120_s16, %s1345_s16   ;;  %s1049_s15 = sphi %s1118_s15, %s1344_s15  }
   0x5   : > { %s29_s23 = sadd.s32 1, %s1065_s19  ;;  %s138_s24 = sadd.s32 1, %s1057_s17 }
   0x6   : > { %p31_p0 = scmp.ge.s32.totalorder %s29_s23, 2  ;;  %p148_p1 = scmp.ne.s32.totalorder %s1057_s17, %s1053_s16 }
   0x7   : > { %p149_p2 = scmp.eq.s32.totalorder %s863_s21, 1  ;;  %p154_p3 = scmp.ne.s32.totalorder %s1053_s16, %s1049_s15 }
   0x8   : > { %s1350_s23 = smov (%p31_p0, %s29_s23), 0  ;;  %p155_p5 = scmp.eq.s32.totalorder %s864_s22, 1 }
   0x9   : > { %p1158_p4 = por %p149_p2, %p148_p1  ;;  %s133_s26 = ssub.s32 %s1065_s19, %s1350_s23 }
   0xa   : > { %p867_p6 = scmp.ge.s32.totalorder %s1069_s20, 1  ;;  %p136_p7 = scmp.eq.s32.totalorder %s133_s26, 0 }
   0xb   : > { %p1165_p8 = por %p155_p5, %p154_p3  ;;  %p201_p9 = scmp.lt.s32.totalorder %s1069_s20, 3 }
   0xc   : > { %s1171_s28 = scalar_select %p136_p7, %s1057_s17, %s138_s24  }
   0xd   : > { %p202_p10 = pnand %p867_p6, %p201_p9 }
   0xe   : > { %p237_p11 = scmp.lt.s32.totalorder (!%p202_p10), %s1061_s18, 1  ;;  %vm255_vm0 = vcmask (!%p202_p10), 1040384   ;;  %vm256_vm1 = vsmask.f32 (!%p202_p10), 256  ;;  %v258_v1 = vld [vmem:[#allocation2] sm:$0x1] (!%p202_p10)  ;;  %v281_v5 = vlaneseq (!%p202_p10) }
   0xf   : > { %205 = sbr.rel (%p202_p10) target bundleno = 430 (0x1ae), region = 36  ;;  %vm1176_vm2 = vmand (!%p202_p10), %vm255_vm0, %vm256_vm1  ;;  %v262_v2 = vld [vmem:[#allocation2 + $0x1] sm:$0x1] (!%p202_p10)  ;;  %v1071_v3 = vmov (!%p202_p10), 1935823168   ;;  %s1072_s12 = smov (!%p202_p10), 120  }
  0x10   : > { %v279_v4 = vunpack.c.l.s4 (!%p202_p10), %v1071_v3  ;;  %v282_v11 = vshrl.u32 (!%p202_p10), %v281_v5, 7  ;;  %v266_v13 = vld [vmem:[#allocation3] sm:$0x1] (!%p202_p10)  ;;  %s1073_s13 = smov (!%p202_p10), 126   ;;  %s1074_s14 = smov (!%p202_p10), 116   ;;  %v1082_v37 = vmov (!%p202_p10), 0.0  }
  0x11   : > { %s1075_s21 = smov (!%p202_p10), 118   ;;  %s1076_s22 = smov (!%p202_p10), 125   ;;  %901 = vmatprep.subr.bf16.mxu0 (!%p202_p10), %v1082_v37  ;;  %vm1087_vm3 = vmmov (!%p202_p10), 0   ;;  %v674_v39 = vld [vmem:[%s1324_s3] sm:$0xff] (!%p202_p10)  ;;  %v675_v40 = vld [vmem:[%s1324_s3 + $0x8] sm:$0xff] (!%p202_p10)  ;;  %v1088_v41 = vmov (!%p202_p10), 0  }
  0x12   : > { %v280_v10 = vunpack.c.0.s8 (!%p202_p10), %v279_v4  ;;  %s1077_s24 = smov (!%p202_p10), 127   ;;  %s1078_s26 = smov (!%p202_p10), 122   ;;  %903 = vmatprep.mubr.msk.bf16.mxu0 (!%p202_p10), %vm1087_vm3, %v1082_v37  ;;  %983 = vset.pattern.permute.xlu0 (!%p202_p10), %v1088_v41  ;;  %vm499_vm4 = vcmask (!%p202_p10), 982016   ;;  %vm322_vm5 = vcmask (!%p202_p10), 1041409   ;;  %vm323_vm6 = vsmask.f32 (!%p202_p10), 1280 }
  0x13   : > { %s1081_s5 = smov (!%p202_p10), 123   ;;  %s1083_s6 = smov (!%p202_p10), 117   ;;  %984 = vset.pattern.permute.xlu1 (!%p202_p10), %v1088_v41  ;;  %v502_v43 = vld [vmem:[#allocation3 + $0x4] sm:$0x1] (!%p202_p10)  ;;  %vm319_vm7 = vcmask (!%p202_p10), 1031168   ;;  %vm382_vm8 = vcmask (!%p202_p10), 1042434   ;;  %vm1199_vm10 = vmand (!%p202_p10), %vm322_vm5, %vm323_vm6 }
  0x14   : > { %v283_v12 = vsub.s32 (!%p202_p10), %v280_v10, %v282_v11  ;;  %s1086_s9 = smov (!%p202_p10), 115   ;;  %vm383_vm9 = vsmask.f32 (!%p202_p10), 2304  ;;  %v325_v48 = vld [vmem:[#allocation3] sm:$0x2] (!%p202_p10)  ;;  %vm608_vm11 = vcmask (!%p202_p10), 949248  }
  0x15   : > { %vm1206_vm12 = vmand (!%p202_p10), %vm382_vm8, %vm383_vm9  ;;  %v611_v54 = vld [vmem:[#allocation3 + $0x4] sm:$0x4] (!%p202_p10)  ;;  %vm553_vm13 = vcmask (!%p202_p10), 965632   ;;  %v556_v59 = vld [vmem:[#allocation3 + $0x4] sm:$0x2] (!%p202_p10)  ;;  %vm291_vm1 = vcmask (!%p202_p10), 1039360  }
  0x16   : > { %s238_s29 = scalar_select %p237_p11, %s1061_s18, 1  ;;  %vm294_vm14 = vsmask.f32 7938  ;;  %vm354_vm15 = vsmask.f32 7942  ;;  %vm440_vm9 = vcmask 998400  }
  0x17   : > { %vm444_vm3 = vsmask.f32 3328  ;;  %vm1217_vm6 = vmand %vm255_vm0, %vm294_vm14  ;;  %v446_v10 = vld [vmem:[#allocation3] sm:$0x8]  ;;  %vm379_vm0 = vcmask 1014784  }
  0x18   : > { %s869_s30 = sshll.u32 %s238_s29, 1  ;;  %s1079_s29 = smov 124   ;;  %vm414_vm14 = vsmask.f32 7946 }
  0x19   : > { %s243_s7 = scalar_lea.vmem %s1321_s0, %s869_s30  ;;  %s250_s8 = sadd.s32 1, %s869_s30 }
  0x1a   : > { %s251_s11 = scalar_lea.vmem %s1322_s1, %s250_s8  ;;  %v254_v6 = vld [vmem:[%s243_s7] sm:$0x1]  ;;  %s1080_s30 = smov 121  }
  0x1b   : > { %v259_v7 = vsel %vm1176_vm2, %v254_v6, %v258_v1  ;;  %v261_v8 = vld [vmem:[%s251_s11] sm:$0x1]  ;;  %s1084_s7 = smov 119   ;;  %s1085_s8 = smov 114  }
  0x1c   : > { %260 = vst [vmem:[#allocation2] sm:$0x1] %v259_v7  ;;  %v263_v9 = vsel %vm1176_vm2, %v261_v8, %v262_v2 }
  0x1d   : > { %264 = vst [vmem:[#allocation2 + $0x1] sm:$0x1] %v263_v9 }
  0x23   : > { %v265_v14 = vld [vmem:[#allocation2] sm:$0x1] }
  0x24   : > { %v876_v15 = vld.sshfl [vmem:[#allocation2] sm:$0x5 pattern:$0x73625140]  ;;  %v267_v16 = vsel %vm1176_vm2, %v265_v14, %v266_v13 }
  0x25   : > { %v495_v17 = vrot.slane %v876_v15, %v283_v12  ;;  %v308_v18 = vcombine.low %v876_v15, %v876_v15  ;;  %v985_v19 = vld [vmem:[#allocation2] ss:$0 sps:$4 sm:$0x33]   ;;  %268 = vst [vmem:[#allocation3] sm:$0x1] %v267_v16 }
  0x26   : > { %v986_v20 = vld [vmem:[#allocation2] ss:$0 sps:$4 sm:$0x33]   ;;  %v597_v22 = vrot.slane %v985_v19, %v283_v12 }
  0x27   : > { %496 = vrot.lane.b32.xlu1 %v495_v17, %s1072_s12  ;;  %v315_v21 = vrot.slane %v308_v18, %v283_v12  ;;  %v345_v23 = vshll.u32 %v495_v17, 16  ;;  %v428_v24 = vrot.slane %v986_v20, %v283_v12  ;;  %v987_v26 = vld [vmem:[#allocation2] ss:$0 sps:$4 sm:$0x33]   ;;  %v385_v18 = vld [vmem:[#allocation3] sm:$0x4] }
  0x28   : > { %v604_v25 = vrot.slane %v597_v22, %v283_v12  ;;  %v368_v29 = vrot.slane %v987_v26, %v283_v12  ;;  %v988_v31 = vld [vmem:[#allocation2] ss:$0 sps:$4 sm:$0x33]  }
  0x29   : > { %316 = vrot.lane.b32.xlu0 %v315_v21, %s1073_s13  ;;  %v347_v27 = vrot.slane %v345_v23, 7  ;;  %v429_v28 = vcombine.low %v428_v24, %v428_v24  ;;  %v468_v33 = vrot.slane %v345_v23, 5  ;;  %v652_v34 = vrot.slane %v988_v31, %v283_v12 }
  0x2a   : > { %v375_v32 = vrot.slane %v368_v29, %v283_v12  ;;  %v407_v35 = vrot.slane %v345_v23, 6 }
  0x2b   : > { %605 = vrot.lane.b32.xlu1 %v604_v25, %s1074_s14  ;;  %v436_v30 = vrot.slane %v429_v28, %v283_v12  ;;  %v653_v36 = vcombine.low %v652_v34, %v652_v34 }
  0x2c   : > { %v296_v5 = vld [vmem:[#allocation3] sm:$0x1] }
  0x2d   : > { %550 = vrot.lane.b32.xlu0 %v315_v21, %s1075_s21  ;;  %v660_v38 = vrot.slane %v653_v36, %v283_v12 }
  0x2f   : > { %348 = vrot.lane.b32.xlu1 %v347_v27, %s1076_s22  ;;  %s234_s22 = sand.u32 1, %s1053_s16  }
  0x31   : > { %288 = vrot.lane.b32.xlu0 %v345_v23, %s1077_s24  ;;  %s868_s24 = sshll.u32 %s234_s22, 3 }
  0x33   : > { %437 = vrot.lane.b32.xlu1 %v436_v30, %s1078_s26  ;;  %s236_s26 = scalar_lea.vmem [#allocation4], %s868_s24 }
  0x35   : > { %376 = vrot.lane.b32.xlu0 %v375_v32, %s1079_s29  ;;  %s773_s29 = sshll.u32 %s236_s26, 4  ;;  %s1268_s29 = int_to_ptr.vmem [resolvable:$true] %s773_s29 }
  0x37   : > { %469 = vrot.lane.b32.xlu1 %v468_v33, %s1080_s30  ;;  %s893_s30 = sshll.u32 %s1061_s18, 7  ;;  %s1090_s18 = smov [#allocation4]  }
  0x38   : > { %s995_s10 = sshll.u32 %s1090_s18, 4  ;;  %s996_s10 = int_to_ptr.vmem [resolvable:$false] %s995_s10 }
  0x39   : > { %408 = vrot.lane.b32.xlu0 %v407_v35, %s1081_s5  ;;  %s997_s11 = scalar_lea.vmem %s996_s10, 256  ;;  %p998_p1 = scmp.lt.s32.totalorder %s1268_s29, %s996_s10 }
  0x3b   : > { %579 = vrot.lane.b32.xlu1 %v347_v27, %s1083_s6 }
  0x3d   : > { %524 = vrot.lane.b32.xlu0 %v345_v23, %s1084_s7  ;;  %s1273_s7 = scalar_lea.hbm %s1325_s4, %s893_s30 }
  0x3f   : > { %661 = vrot.lane.b32.xlu1 %v660_v38, %s1085_s8  ;;  %s1275_s8 = scalar_lea.sflag [#allocation5], %s234_s22 }
  0x41   : > { %634 = vrot.lane.b32.xlu0 %v407_v35, %s1086_s9  ;;  %s991_s9 = scalar_lea.vmem %s1268_s29, 128 }
  0x42   : > { %p992_p12 = scmp.ne.s32.totalorder %s1268_s29, %s991_s9  ;;  %p999_p2 = scmp.lt.s32.totalorder %s997_s11, %s991_s9 }
  0x43   : > { %683 = vperm.xlu1 %984, %v675_v40  }
  0x44   : > { %p993_p13 = pnand %p992_p12, %p1158_p4  ;;  %p1000_p3 = por %p999_p2, %p998_p1 }
  0x45   : > { %678 = vperm.xlu0 %983, %v674_v39  }
  0x46   : > { %p994_p0 = pneg %p993_p13 }
  0x48   : > { %p1001_p5 = pnand %p1000_p3, %p994_p0 }
  0x99   : > { %v497_v42 = vpop.permute.xlu1 %496 }
  0x9a   : > { %v498_v44 = vrot.slane %v497_v42, 4 }
  0x9b   : > { %v317_v45 = vpop.permute.xlu0 %316 }
  0x9c   : > { %v500_v46 = vsel %vm499_vm4, %v497_v42, %v498_v44  ;;  %v318_v49 = vrot.slane %v317_v45, 4  ;;  %vm351_vm4 = vcmask 1022976   ;;  %v667_v42 = vld [vmem:[#allocation3 + $0x4] sm:$0x8] }
  0x9d   : > { %v503_v50 = vsel %vm1176_vm2, %v500_v46, %v502_v43  ;;  %v606_v51 = vpop.permute.xlu1 %605  ;;  %vm443_vm2 = vcmask 1043459  }
  0x9e   : > { %504 = vst [vmem:[#allocation3 + $0x4] sm:$0x1] %v503_v50  ;;  %v320_v52 = vsel %vm319_vm7, %v317_v45, %v318_v49  ;;  %v607_v55 = vrot.slane %v606_v51, 4  ;;  %vm1222_vm7 = vmand %vm322_vm5, %vm354_vm15  ;;  %vm475_vm5 = vsmask.f32 7950 }
  0x9f   : > { %v326_v56 = vsel %vm1199_vm10, %v320_v52, %v325_v48  ;;  %v551_v57 = vpop.permute.xlu0 %550  ;;  %vm1240_vm15 = vmand %vm443_vm2, %vm475_vm5 }
  0xa0   : > { %327 = vst [vmem:[#allocation3] sm:$0x2] %v326_v56  ;;  %v609_v58 = vsel %vm608_vm11, %v606_v51, %v607_v55  ;;  %v552_v60 = vrot.slane %v551_v57, 4  ;;  %vm582_vm11 = vcmask 957440   ;;  %v1089_v55 = vmov 65535  }
  0xa1   : > { %v612_v61 = vsel %vm1206_vm12, %v609_v58, %v611_v54  ;;  %v349_v62 = vpop.permute.xlu1 %348 }
  0xa2   : > { %613 = vst [vmem:[#allocation3 + $0x4] sm:$0x4] %v612_v61  ;;  %v554_v63 = vsel %vm553_vm13, %v551_v57, %v552_v60  ;;  %v350_v1 = vrot.slane %v349_v62, 4  ;;  %vm472_vm13 = vcmask 990208   ;;  %v990_v60 = vld [vmem:[%s1323_s2] sm:$0xff]  }
  0xa3   : > { %v557_v0 = vsel %vm1199_vm10, %v554_v63, %v556_v59  ;;  %v289_v2 = vpop.permute.xlu0 %288  ;;  %vm1227_vm10 = vmand %vm443_vm2, %vm444_vm3  ;;  %vm411_vm3 = vcmask 1006592   ;;  %vm664_vm2 = vcmask 932864  }
  0xa4   : > { %558 = vst [vmem:[#allocation3 + $0x4] sm:$0x2] %v557_v0  ;;  %v290_v4 = vrot.slane %v289_v2, 4  ;;  %v352_v12 = vsel %vm351_vm4, %v349_v62, %v350_v1  ;;  %vm700_vm4 = vcmask 1046528  }
  0xa5   : > { %v438_v7 = vpop.permute.xlu1 %437  ;;  %v530_v40 = vld [vmem:[#allocation3 + $0x4] sm:$0x1]  ;;  %v702_v56 = vsel %vm700_vm4, 4294967295, %v1089_v55 }
  0xa6   : > { %v292_v8 = vsel %vm291_vm1, %v289_v2, %v290_v4  ;;  %v439_v11 = vrot.slane %v438_v7, 4  ;;  %vm527_vm1 = vcmask 973824  }
  0xa7   : > { %v356_v13 = vld [vmem:[#allocation3] sm:$0x2]  ;;  %v297_v14 = vsel %vm1217_vm6, %v292_v8, %v296_v5  ;;  %v377_v15 = vpop.permute.xlu0 %376 }
  0xa8   : > { %v357_v16 = vsel %vm1222_vm7, %v352_v12, %v356_v13  ;;  %298 = vst [vmem:[#allocation3] sm:$0x1] %v297_v14  ;;  %v441_v17 = vsel %vm440_vm9, %v438_v7, %v439_v11  ;;  %v378_v19 = vrot.slane %v377_v15, 4 }
  0xa9   : > { %358 = vst [vmem:[#allocation3] sm:$0x2] %v357_v16  ;;  %v447_v20 = vsel %vm1227_vm10, %v441_v17, %v446_v10  ;;  %v470_v21 = vpop.permute.xlu1 %469  ;;  %v640_v52 = vld [vmem:[#allocation3 + $0x4] sm:$0x4] }
  0xaa   : > { %448 = vst [vmem:[#allocation3] sm:$0x8] %v447_v20  ;;  %v380_v22 = vsel %vm379_vm0, %v377_v15, %v378_v19  ;;  %v471_v25 = vrot.slane %v470_v21, 4 }
  0xab   : > { %v386_v23 = vsel %vm1206_vm12, %v380_v22, %v385_v18  ;;  %v409_v24 = vpop.permute.xlu0 %408  ;;  %v585_v32 = vld [vmem:[#allocation3 + $0x4] sm:$0x2]  ;;  %vm1245_vm12 = vmand %vm382_vm8, %vm414_vm14  ;;  %vm637_vm8 = vcmask 941056  }
  0xac   : > { %387 = vst [vmem:[#allocation3] sm:$0x4] %v386_v23  ;;  %v410_v29 = vrot.slane %v409_v24, 4  ;;  %v473_v35 = vsel %vm472_vm13, %v470_v21, %v471_v25 }
  0xad   : > { %v580_v26 = vpop.permute.xlu1 %579 }
  0xae   : > { %v581_v27 = vrot.slane %v580_v26, 4  ;;  %v412_v45 = vsel %vm411_vm3, %v409_v24, %v410_v29 }
  0xaf   : > { %v525_v30 = vpop.permute.xlu0 %524 }
  0xb0   : > { %v583_v31 = vsel %vm582_vm11, %v580_v26, %v581_v27  ;;  %v526_v33 = vrot.slane %v525_v30, 4 }
  0xb1   : > { %v477_v34 = vld [vmem:[#allocation3] sm:$0x8]  ;;  %v586_v37 = vsel %vm1222_vm7, %v583_v31, %v585_v32  ;;  %v662_v38 = vpop.permute.xlu1 %661  ;;  %vm696_vm7 = vcmask 121856  }
  0xb2   : > { %v478_v39 = vsel %vm1240_vm15, %v473_v35, %v477_v34  ;;  %587 = vst [vmem:[#allocation3 + $0x4] sm:$0x2] %v586_v37  ;;  %v528_v41 = vsel %vm527_vm1, %v525_v30, %v526_v33  ;;  %v663_v43 = vrot.slane %v662_v38, 4 }
  0xb3   : > { %479 = vst [vmem:[#allocation3] sm:$0x8] %v478_v39  ;;  %v416_v44 = vld [vmem:[#allocation3] sm:$0x4]  ;;  %v531_v46 = vsel %vm1217_vm6, %v528_v41, %v530_v40  ;;  %v635_v47 = vpop.permute.xlu0 %634  ;;  %vm701_vm6 = vcmask 1047552  }
  0xb4   : > { %v417_v48 = vsel %vm1245_vm12, %v412_v45, %v416_v44  ;;  %532 = vst [vmem:[#allocation3 + $0x4] sm:$0x1] %v531_v46  ;;  %v665_v49 = vsel %vm664_vm2, %v662_v38, %v663_v43  ;;  %v636_v50 = vrot.slane %v635_v47, 4  ;;  %v703_v57 = vsel %vm701_vm6, %v702_v56, 0 }
  0xb5   : > { %418 = vst [vmem:[#allocation3] sm:$0x4] %v417_v48  ;;  %v668_v51 = vsel %vm1227_vm10, %v665_v49, %v667_v42 }
  0xb6   : > { %669 = vst [vmem:[#allocation3 + $0x4] sm:$0x8] %v668_v51  ;;  %v638_v53 = vsel %vm637_vm8, %v635_v47, %v636_v50 }
  0xb7   : > { %v641_v54 = vsel %vm1245_vm12, %v638_v53, %v640_v52 }
  0xb8   : > { %642 = vst [vmem:[#allocation3 + $0x4] sm:$0x4] %v641_v54 }
  0xbf   : > { %v989_v58 = vld [vmem:[#allocation3] sm:$0xff]  }
  0xc0   : > { %v705_v59 = vand.u32 %v989_v58, %v703_v57 }
  0xc2   : > { %902 = vmatpush3.bf16.msra.mxu0 %v705_v59  ;;  %v684_v63 = vpop.permute.xlu1 %683 }
  0xc4   : > { %v679_v61 = vpop.permute.xlu0 %678 }
  0xc5   : > { %904 = vmatmul.mubr.msk.bf16.vlgmr.msra.gmra.mrb[0].mxu0 %vm696_vm7, %v990_v60 }
 0x198   : > { %v741_v62 = vpop.f32.mrb[0].mxu0 }
 0x199   : > { %v905_v0 = vpop.f32.mrb[1].mxu0  ;;  %v742_v2 = vadd.f32 %v741_v62, %v679_v61 }
 0x19a   : > { %v744_v1 = vpop.f32.mrb[2].mxu0 }
 0x19b   : > { %v745_v3 = vadd.f32 %v744_v1, %v684_v63  ;;  %v906_v4 = vpop.f32.mrb[3].mxu0 }
 0x19d   : > { %v897_v5 = vpack.c.bf16 %v745_v3, %v742_v2 }
 0x19f   : > { %898 = vst [vmem:[%s236_s26] sm:$0xff] %v897_v5  }
 0x1a0   : > { %1004 = shalt.err (!%p1001_p5)
}
 0x1a1   : > { %s1005_s12 = scalar_lea.hbm %s1273_s7, 128  ;;  %s1009_s21 = scalar_lea.hbm %s1325_s4, 256 }
 0x1a2   : > { %p1006_p6 = scmp.ne.s32.totalorder %s1273_s7, %s1005_s12  ;;  %p1010_p10 = scmp.lt.u32.totalorder %s1273_s7, %s1325_s4 }
 0x1a3   : > { %p1011_p11 = scmp.lt.u32.totalorder %s1009_s21, %s1005_s12  ;;  %p1013_p13 = scmp.lt.u32.totalorder %s1005_s12, %s1273_s7 }
 0x1a4   : > { %p1007_p7 = pnand %p1006_p6, %p1158_p4 }
 0x1a5   : > { %p1012_p12 = por %p1011_p11, %p1010_p10 }
 0x1a6   : > { %p1008_p9 = pneg %p1007_p7 }
 0x1a7   : > { %p1014_p0 = por %p1013_p13, %p1012_p12 }
 0x1a9   : > { %p1015_p1 = pnand %p1014_p0, %p1008_p9 }
 0x1ab   : > { %1018 = shalt.err (!%p1015_p1)
}
 0x1ac   : > { %s1091_s26 = smov 64   ;;  %s1092_s30 = smov 4  }
 0x1ad   : > { %907 = dma.vmem_to_hbm [thread:$0]  (%p1158_p4), %s1268_s29, 128, %s1273_s7, %s1275_s8, %s1091_s26, %s1091_s26, %s1092_s30  }
 0x1ae PF: > { %p913_p2 = scmp.ge.s32.totalorder %s1069_s20, 2  ;;  %s788_s5 = sand.u32 1, %s1049_s15  }
 0x1af   : > { %s789_s6 = scalar_lea.sflag [#allocation5], %s788_s5 }
 0x1b0   : > { %p910_p3 = pnand %p913_p2, %p1165_p8 }
 0x1b2   : > { %1044 = dma.done.wait (!%p910_p3), %s789_s6, 128  }
 0x1b3   : > { %1046 = vsyncadd (!%p910_p3), %s789_s6, 4294967168  ;;  %s17_s20 = sadd.s32 1, %s1069_s20   ;;  %s1344_s15 = smov %s1053_s16 }
 0x1b4   : > { %p14_p5 = scmp.ge.s32.totalorder %s17_s20, 4   ;;  %s1345_s16 = smov %s1057_s17 }
 0x1b5   : > { %s1346_s17 = smov %s1171_s28  ;;  %s1347_s18 = smov %s1065_s19 }
 0x1b6   : > { %s1348_s19 = smov %s1350_s23  ;;  %16 = sbr.rel (!%p14_p5) target bundleno = 4 (0x4), region = 74 }
 0x1bd   :  { %794 = vsyncpa [#allocation5], 1 }
 0x1be   :  { %796 = vsyncpa [#allocation5 + $0x1], 1 }

</bundles_post_ra>
